<compile_context>
chip_gen: v7x
topology: tpu7x:2x2x1
jax: 0.10.0
libtpu: 0.0.40
codegen_flags: <defaults>
</compile_context>

<pallas_src>
import jax
import jax.numpy as jnp
from jax.experimental import pallas as pl
from jax.experimental.pallas import tpu as pltpu

_TILE_N = 1024  # batch rows per grid step (multiple of 8); clipped to N below.


def _lpm_kernel(x_ref, w_ref, b_ref, wf_ref, bf_ref, o_ref):
    # x_ref : (Lyr, TILE_N, C)  C = seq_len * L, lane-dense (C multiple of 128 here)
    # w_ref : (Lyr, C, O)       pool folded in: W2[l, s*L+k, o] = W[l,o,s]/L
    # b_ref : (Lyr, O)          per-layer linear biases
    # wf_ref: (Lyr, O)          final.weight reshaped into per-layer slices
    # bf_ref: (1,)              final.bias (SMEM scalar)
    # o_ref : (TILE_N, 1)
    #
    # Fused pool+linear: one batched 128-deep MXU contraction per layer.
    r = jnp.einsum("lnc,lco->lno", x_ref[...], w_ref[...],
                   preferred_element_type=jnp.float32)              # (Lyr, TILE_N, O)
    r = jnp.maximum(r + b_ref[...][:, None, :], 0.0)                # bias + ReLU

    # final Linear(O*Lyr -> 1) == sum over (layer, output) of r * wf.
    # VPU multiply, keep lane-dense (TILE_N, O) until the last keepdims sum.
    contrib = jnp.sum(r * wf_ref[...][:, None, :], axis=0)          # (TILE_N, O)
    out = jnp.sum(contrib, axis=-1, keepdims=True) + bf_ref[0]      # (TILE_N, 1)
    o_ref[...] = out.astype(o_ref.dtype)


def loss_prediction_module_forward(x, W, b, Wf, bf):
    """
    x  : (num_layers, N, seq_len, L)            activations (dtype passed through)
    W  : (num_layers, outputs_size, seq_len)    PyTorch Linear weight layout (out, in)
    b  : (num_layers, outputs_size)
    Wf : (1, num_layers * outputs_size)         PyTorch final.weight
    bf : (1,)                                   PyTorch final.bias
    returns (N, 1) float32
    """
    num_layers, N, seq_len, L = x.shape
    outputs_size = W.shape[1]
    C = seq_len * L

    # Wrapper-side (one-time, XLA-fused) layout prep:
    #   x2[l, n, s*L+k] = x[l, n, s, k]          -- free contiguous reshape
    #   W2[l, s*L+k, o] = W[l, o, s] / L         -- pool (mean over L) folded in
    x2 = x.reshape(num_layers, N, C)
    Wt = W.astype(jnp.float32).transpose(0, 2, 1) * (1.0 / L)        # (Lyr, S, O)
    W2 = jnp.repeat(Wt, L, axis=1)                                    # (Lyr, C, O)
    b_f = b.astype(jnp.float32)
    Wf_l = Wf.reshape(num_layers, outputs_size).astype(jnp.float32)   # (Lyr, O)
    bf_1d = bf.reshape(1).astype(jnp.float32)

    tile_n = min(_TILE_N, N)
    grid = (pl.cdiv(N, tile_n),)

    # x streams through VMEM (double-buffered); weights/biases stay resident
    # via constant index_maps; final bias is an SMEM scalar.
    x_spec = pl.BlockSpec((num_layers, tile_n, C), lambda i: (0, i, 0))
    w_spec = pl.BlockSpec((num_layers, C, outputs_size), lambda i: (0, 0, 0))
    b_spec = pl.BlockSpec((num_layers, outputs_size), lambda i: (0, 0))
    wf_spec = pl.BlockSpec((num_layers, outputs_size), lambda i: (0, 0))
    bf_spec = pl.BlockSpec(memory_space=pltpu.MemorySpace.SMEM)
    out_spec = pl.BlockSpec((tile_n, 1), lambda i: (i, 0))

    return pl.pallas_call(
        _lpm_kernel,
        out_shape=jax.ShapeDtypeStruct((N, 1), jnp.float32),
        grid=grid,
        in_specs=[x_spec, w_spec, b_spec, wf_spec, bf_spec],
        out_specs=out_spec,
        compiler_params=pltpu.CompilerParams(
            dimension_semantics=("parallel",)),   # v7x: shard N tiles across 2 TCs
    )(x2, W2, b_f, Wf_l, bf_1d)


def _reference(x, W, b, Wf, bf):
    # Pure-JAX mirror of the PyTorch forward.
    results = []
    for i in range(x.shape[0]):
        r = jnp.mean(x[i], axis=-1)              # (N, seq_len)   avgpool + flatten
        r = r @ W[i].T + b[i]                    # (N, outputs_size)
        r = jnp.maximum(r, 0.0)                  # ReLU
        results.append(r)
    final = jnp.concatenate(results, axis=1)     # (N, outputs_size*num_layers)
    return final @ Wf.T + bf                     # (N, 1)


if __name__ == "__main__":
    num_layers = 3
    batch = 2
    seq_len = 8
    L = 16
    outputs_size = 16

    key = jax.random.PRNGKey(0)
    kx, kw, kb, kwf, kbf = jax.random.split(key, 5)

    x = jax.random.normal(kx, (num_layers, batch, seq_len, L), dtype=jnp.float32)

    # Deterministic parameter init (PyTorch Linear-style uniform bounds).
    lim1 = 1.0 / (seq_len ** 0.5)
    W = jax.random.uniform(kw, (num_layers, outputs_size, seq_len),
                           minval=-lim1, maxval=lim1, dtype=jnp.float32)
    b = jax.random.uniform(kb, (num_layers, outputs_size),
                           minval=-lim1, maxval=lim1, dtype=jnp.float32)

    lim2 = 1.0 / ((outputs_size * num_layers) ** 0.5)
    Wf = jax.random.uniform(kwf, (1, outputs_size * num_layers),
                            minval=-lim2, maxval=lim2, dtype=jnp.float32)
    bf = jax.random.uniform(kbf, (1,), minval=-lim2, maxval=lim2, dtype=jnp.float32)

    out = loss_prediction_module_forward(x, W, b, Wf, bf)
    out = jax.block_until_ready(out)

    ref = _reference(x, W, b, Wf, bf)
    assert out.shape == (batch, 1)
    assert jnp.allclose(out, ref, atol=1e-5, rtol=1e-5), (out, ref)

    print("KERNEL_OK")
</pallas_src>

<mosaic_0001>
module attributes {stable_mosaic.version = 11 : i64} {
  func.func @_lpm_kernel(%arg0: i32, %arg1: memref<3x2x128xf32, #tpu.memory_space<vmem>>, %arg2: memref<3x128x16xf32, #tpu.memory_space<vmem>>, %arg3: memref<3x16xf32, #tpu.memory_space<vmem>>, %arg4: memref<3x16xf32, #tpu.memory_space<vmem>>, %arg5: memref<1xf32, #tpu.memory_space<smem>>, %arg6: memref<2x1xf32, #tpu.memory_space<vmem>>) attributes {dimension_semantics = [#tpu.dimension_semantics<parallel>], iteration_bounds = array<i64: 1>, scalar_prefetch = 0 : i64, scratch_operands = 0 : i64, tpu.core_type = #tpu.core_type<tc>, window_params = [{transform_indices = @transform_0, window_bounds = array<i64: 3, 2, 128>}, {pipeline_mode = #tpu.pipeline_mode<synchronous>, transform_indices = @transform_1, window_bounds = array<i64: 3, 128, 16>}, {pipeline_mode = #tpu.pipeline_mode<synchronous>, transform_indices = @transform_2, window_bounds = array<i64: 3, 16>}, {pipeline_mode = #tpu.pipeline_mode<synchronous>, transform_indices = @transform_3, window_bounds = array<i64: 3, 16>}, {transform_indices = @transform_4, window_bounds = array<i64: 1>}, {transform_indices = @transform_5, window_bounds = array<i64: 2, 1>}]} {
    %c0 = arith.constant 0 : index
    %c0_0 = arith.constant 0 : index
    %c0_1 = arith.constant 0 : index
    %0 = vector.load %arg1[%c0, %c0_0, %c0_1] : memref<3x2x128xf32, #tpu.memory_space<vmem>>, vector<3x2x128xf32>
    %c0_2 = arith.constant 0 : index
    %c0_3 = arith.constant 0 : index
    %c0_4 = arith.constant 0 : index
    %1 = vector.load %arg2[%c0_2, %c0_3, %c0_4] : memref<3x128x16xf32, #tpu.memory_space<vmem>>, vector<3x128x16xf32>
    "tpu.trace_start"() <{level = 10 : i32, message = "lnc,lco->lno"}> : () -> ()
    %cst = arith.constant dense<0.000000e+00> : vector<3x2x16xf32>
    %2 = tpu.matmul %0, %1, %cst {dimension_numbers = #tpu.dot_dimension_numbers<[2], [1], [1], [2], [0, 0, 0, 1, 1, 2], [0], [0]>} : vector<3x2x128xf32>, vector<3x128x16xf32>, vector<3x2x16xf32> -> vector<3x2x16xf32>
    "tpu.trace_stop"() : () -> ()
    %c0_5 = arith.constant 0 : index
    %c0_6 = arith.constant 0 : index
    %3 = vector.load %arg3[%c0_5, %c0_6] : memref<3x16xf32, #tpu.memory_space<vmem>>, vector<3x16xf32>
    %4 = vector.shape_cast %3 : vector<3x16xf32> to vector<3x1x16xf32>
    %5 = vector.broadcast %4 : vector<3x1x16xf32> to vector<3x2x16xf32>
    %6 = arith.addf %2, %5 : vector<3x2x16xf32>
    %cst_7 = arith.constant 0.000000e+00 : f32
    %7 = vector.broadcast %cst_7 : f32 to vector<3x2x16xf32>
    %8 = arith.maximumf %6, %7 : vector<3x2x16xf32>
    %c0_8 = arith.constant 0 : index
    %c0_9 = arith.constant 0 : index
    %9 = vector.load %arg4[%c0_8, %c0_9] : memref<3x16xf32, #tpu.memory_space<vmem>>, vector<3x16xf32>
    %10 = vector.shape_cast %9 : vector<3x16xf32> to vector<3x1x16xf32>
    %11 = vector.broadcast %10 : vector<3x1x16xf32> to vector<3x2x16xf32>
    %12 = arith.mulf %8, %11 : vector<3x2x16xf32>
    %cst_10 = arith.constant dense<0.000000e+00> : vector<2x16xf32>
    %13 = vector.multi_reduction <add>, %12, %cst_10 [0] : vector<3x2x16xf32> to vector<2x16xf32>
    %cst_11 = arith.constant dense<0.000000e+00> : vector<2xf32>
    %14 = vector.multi_reduction <add>, %13, %cst_11 [1] : vector<2x16xf32> to vector<2xf32>
    %15 = vector.shape_cast %14 : vector<2xf32> to vector<2x1xf32>
    %c0_12 = arith.constant 0 : index
    %16 = memref.load %arg5[%c0_12] : memref<1xf32, #tpu.memory_space<smem>>
    %17 = vector.broadcast %16 : f32 to vector<2x1xf32>
    %18 = arith.addf %15, %17 : vector<2x1xf32>
    %c0_13 = arith.constant 0 : index
    %c0_14 = arith.constant 0 : index
    %19 = vector.load %arg6[%c0_13, %c0_14] : memref<2x1xf32, #tpu.memory_space<vmem>>, vector<2x1xf32>
    tpu.vector_store %arg6[%c0_13, %c0_14], %18 {strides = array<i32>} : memref<2x1xf32, #tpu.memory_space<vmem>>, vector<2x1xf32>,
    return
  }
  func.func @transform_0(%arg0: i32) -> (i32, i32, i32) {
    %c0_i32 = arith.constant 0 : i32
    %c0_i32_0 = arith.constant 0 : i32
    %c0_i32_1 = arith.constant 0 : i32
    return %c0_i32, %arg0, %c0_i32_0 : i32, i32, i32
  }
  func.func @transform_1(%arg0: i32) -> (i32, i32, i32) {
    %c0_i32 = arith.constant 0 : i32
    %c0_i32_0 = arith.constant 0 : i32
    %c0_i32_1 = arith.constant 0 : i32
    %c0_i32_2 = arith.constant 0 : i32
    return %c0_i32, %c0_i32_0, %c0_i32_1 : i32, i32, i32
  }
  func.func @transform_2(%arg0: i32) -> (i32, i32) {
    %c0_i32 = arith.constant 0 : i32
    %c0_i32_0 = arith.constant 0 : i32
    %c0_i32_1 = arith.constant 0 : i32
    return %c0_i32, %c0_i32_0 : i32, i32
  }
  func.func @transform_3(%arg0: i32) -> (i32, i32) {
    %c0_i32 = arith.constant 0 : i32
    %c0_i32_0 = arith.constant 0 : i32
    %c0_i32_1 = arith.constant 0 : i32
    return %c0_i32, %c0_i32_0 : i32, i32
  }
  func.func @transform_4(%arg0: i32) -> i32 {
    %c0_i32 = arith.constant 0 : i32
    %c0_i32_0 = arith.constant 0 : i32
    return %c0_i32 : i32
  }
  func.func @transform_5(%arg0: i32) -> (i32, i32) {
    %c0_i32 = arith.constant 0 : i32
    %c0_i32_0 = arith.constant 0 : i32
    return %arg0, %c0_i32 : i32, i32
  }
}

</mosaic_0001>

<bundles_post_ra>
// kernel: tpu_custom_call.1
= control target key start
LH: loop header
LB: loop body
LE: loop exit
PB: predicated region body
PF: predicated region fallthrough
CT: control target
= control target key end

     0   :  { %v620_v0 = vmov 0.0|0.0   ;;  %vm621_vm0 = vmmov 0   ;;  %v622_v8 = vmov 0.0   ;;  %vm368_vm1 = vcmask 123904   ;;  %s853_s1 = inlined_call_operand.vmem [shape: f32[3,128,16], index: 1, kind: input, shape index: {}]   ;;  %s854_s0 = inlined_call_operand.vmem [shape: f32[3,2,128], index: 0, kind: input, shape index: {}]   ;;  %s855_s2 = inlined_call_operand.vmem [shape: f32[3,16], index: 2, kind: input, shape index: {}]   ;;  %s856_s3 = inlined_call_operand.vmem [shape: f32[3,16], index: 3, kind: input, shape index: {}]   ;;  %s857_s4 = inlined_call_operand.<no memory space> [shape: f32[1], index: 4, kind: input, shape index: {}]   ;;  %s858_s5 = inlined_call_operand.vmem [shape: f32[2,1], index: 5, kind: output, shape index: {}]  }
   0x1   :  { %544 = vmatprep.subr.bf16.mxu0 %v620_v0  ;;  %v24_v1 = vld [vmem:[%s853_s1] sm:$0xff]  ;;  %v25_v2 = vld [vmem:[%s853_s1 + $0x8] sm:$0xff]  ;;  %568 = vmatprep.subr.bf16.mxu1 %v620_v0  ;;  %v26_v6 = vld [vmem:[%s853_s1 + $0x10] sm:$0xff]  ;;  %vm380_vm2 = vcmask 1024  }
   0x2   :  { %v40_v3 = vld [vmem:[%s853_s1 + $0x80] sm:$0xff]  ;;  %v545_v4 = vpack.c.bf16 %v25_v2, %v24_v1  ;;  %v41_v5 = vld [vmem:[%s853_s1 + $0x88] sm:$0xff]  ;;  %v27_v7 = vld [vmem:[%s853_s1 + $0x18] sm:$0xff]  ;;  %471 = vmatprep.mubr.msk.f32.mxu0 %vm621_vm0, %v622_v8  ;;  %506 = vmatprep.mubr.msk.f32.mxu1 %vm621_vm0, %v622_v8 }
   0x3   :  { %v569_v9 = vpack.c.bf16 %v41_v5, %v40_v3  ;;  %v42_v10 = vld [vmem:[%s853_s1 + $0x90] sm:$0xff]  ;;  %v43_v11 = vld [vmem:[%s853_s1 + $0x98] sm:$0xff]  ;;  %v548_v12 = vpack.c.bf16 %v27_v7, %v26_v6  ;;  %v28_v14 = vld [vmem:[%s853_s1 + $0x20] sm:$0xff] }
   0x4   :  { %546 = vmatpush3.bf16.msra.mxu0 %v545_v4  ;;  %v572_v13 = vpack.c.bf16 %v43_v11, %v42_v10  ;;  %v29_v15 = vld [vmem:[%s853_s1 + $0x28] sm:$0xff]  ;;  %v44_v16 = vld [vmem:[%s853_s1 + $0xa0] sm:$0xff]  ;;  %v30_v20 = vld [vmem:[%s853_s1 + $0x30] sm:$0xff] }
   0x5   :  { %570 = vmatpush3.bf16.msra.mxu1 %v569_v9  ;;  %547 = vmatprep.subr.bf16.mxu0 %v620_v0  ;;  %v45_v17 = vld [vmem:[%s853_s1 + $0xa8] sm:$0xff]  ;;  %v551_v18 = vpack.c.bf16 %v29_v15, %v28_v14  ;;  %v31_v21 = vld [vmem:[%s853_s1 + $0x38] sm:$0xff]  ;;  %v46_v22 = vld [vmem:[%s853_s1 + $0xb0] sm:$0xff]  ;;  %v623_v14 = vmov 1966171168  }
   0x6   :  { %571 = vmatprep.subr.bf16.mxu1 %v620_v0  ;;  %v575_v19 = vpack.c.bf16 %v45_v17, %v44_v16  ;;  %v47_v23 = vld [vmem:[%s853_s1 + $0xb8] sm:$0xff]  ;;  %v554_v24 = vpack.c.bf16 %v31_v21, %v30_v20  ;;  %v32_v26 = vld [vmem:[%s853_s1 + $0x40] sm:$0xff]  ;;  %v33_v27 = vld [vmem:[%s853_s1 + $0x48] sm:$0xff]  ;;  %v83_v15 = vunpack.c.l.s4 %v623_v14  ;;  %v85_v16 = vlaneseq }
   0x7   :  { %v578_v25 = vpack.c.bf16 %v47_v23, %v46_v22  ;;  %v48_v28 = vld [vmem:[%s853_s1 + $0xc0] sm:$0xff]  ;;  %v49_v29 = vld [vmem:[%s853_s1 + $0xc8] sm:$0xff]  ;;  %v557_v30 = vpack.c.bf16 %v33_v27, %v32_v26  ;;  %v34_v32 = vld [vmem:[%s853_s1 + $0x50] sm:$0xff] }
   0x8   :  { %549 = vmatpush3.bf16.msra.mxu0 %v548_v12  ;;  %v581_v31 = vpack.c.bf16 %v49_v29, %v48_v28  ;;  %v35_v33 = vld [vmem:[%s853_s1 + $0x58] sm:$0xff]  ;;  %v50_v34 = vld [vmem:[%s853_s1 + $0xd0] sm:$0xff]  ;;  %v36_v38 = vld [vmem:[%s853_s1 + $0x60] sm:$0xff]  ;;  %v84_v17 = vunpack.c.0.s8 %v83_v15 }
   0x9   :  { %573 = vmatpush3.bf16.msra.mxu1 %v572_v13  ;;  %550 = vmatprep.subr.bf16.mxu0 %v620_v0  ;;  %v51_v35 = vld [vmem:[%s853_s1 + $0xd8] sm:$0xff]  ;;  %v560_v36 = vpack.c.bf16 %v35_v33, %v34_v32  ;;  %v37_v39 = vld [vmem:[%s853_s1 + $0x68] sm:$0xff]  ;;  %v52_v40 = vld [vmem:[%s853_s1 + $0xe0] sm:$0xff] }
   0xa   :  { %574 = vmatprep.subr.bf16.mxu1 %v620_v0  ;;  %v584_v37 = vpack.c.bf16 %v51_v35, %v50_v34  ;;  %v53_v41 = vld [vmem:[%s853_s1 + $0xe8] sm:$0xff]  ;;  %v563_v42 = vpack.c.bf16 %v37_v39, %v36_v38  ;;  %v38_v44 = vld [vmem:[%s853_s1 + $0x70] sm:$0xff]  ;;  %v39_v45 = vld [vmem:[%s853_s1 + $0x78] sm:$0xff] }
   0xb   :  { %v587_v43 = vpack.c.bf16 %v53_v41, %v52_v40  ;;  %v54_v46 = vld [vmem:[%s853_s1 + $0xf0] sm:$0xff]  ;;  %v55_v47 = vld [vmem:[%s853_s1 + $0xf8] sm:$0xff]  ;;  %v566_v48 = vpack.c.bf16 %v39_v45, %v38_v44  ;;  %v56_v50 = vld [vmem:[%s853_s1 + $0x100] sm:$0xff] }
   0xc   :  { %552 = vmatpush3.bf16.msra.mxu0 %v551_v18  ;;  %v590_v49 = vpack.c.bf16 %v55_v47, %v54_v46  ;;  %v57_v51 = vld [vmem:[%s853_s1 + $0x108] sm:$0xff]  ;;  %v21_v52 = vld [vmem:[%s854_s0] sm:$0x3]  ;;  %v22_v54 = vld [vmem:[%s854_s0 + $0x2] sm:$0x3]  ;;  %v86_v18 = vshrl.u32 %v85_v16, 7 }
   0xd   :  { %576 = vmatpush3.bf16.msra.mxu1 %v575_v19  ;;  %553 = vmatprep.subr.bf16.mxu0 %v620_v0  ;;  %v593_v53 = vpack.c.bf16 %v57_v51, %v56_v50  ;;  %v58_v55 = vld [vmem:[%s853_s1 + $0x110] sm:$0xff]  ;;  %v59_v56 = vld [vmem:[%s853_s1 + $0x118] sm:$0xff]  ;;  %v60_v58 = vld [vmem:[%s853_s1 + $0x120] sm:$0xff] }
   0xe   :  { %577 = vmatprep.subr.bf16.mxu1 %v620_v0  ;;  %v596_v57 = vpack.c.bf16 %v59_v56, %v58_v55  ;;  %v61_v59 = vld [vmem:[%s853_s1 + $0x128] sm:$0xff]  ;;  %v62_v61 = vld [vmem:[%s853_s1 + $0x130] sm:$0xff]  ;;  %v63_v62 = vld [vmem:[%s853_s1 + $0x138] sm:$0xff]  ;;  %v87_v20 = vsub.s32 %v84_v17, %v86_v18  ;;  %v99_v23 = vsub.s32 0, %v86_v18 }
   0xf   :  { %v599_v60 = vpack.c.bf16 %v61_v59, %v60_v58  ;;  %v602_v63 = vpack.c.bf16 %v63_v62, %v62_v61  ;;  %v64_v1 = vld [vmem:[%s853_s1 + $0x140] sm:$0xff]  ;;  %v65_v2 = vld [vmem:[%s853_s1 + $0x148] sm:$0xff]  ;;  %v66_v4 = vld [vmem:[%s853_s1 + $0x150] sm:$0xff] }
  0x10   :  { %555 = vmatpush3.bf16.msra.mxu0 %v554_v24  ;;  %v605_v3 = vpack.c.bf16 %v65_v2, %v64_v1  ;;  %v67_v5 = vld [vmem:[%s853_s1 + $0x158] sm:$0xff]  ;;  %v68_v7 = vld [vmem:[%s853_s1 + $0x160] sm:$0xff]  ;;  %v70_v10 = vld [vmem:[%s853_s1 + $0x170] sm:$0xff] }
  0x11   :  { %579 = vmatpush3.bf16.msra.mxu1 %v578_v25  ;;  %556 = vmatprep.subr.bf16.mxu0 %v620_v0  ;;  %v608_v6 = vpack.c.bf16 %v67_v5, %v66_v4  ;;  %v71_v11 = vld [vmem:[%s853_s1 + $0x178] sm:$0xff]  ;;  %v23_v13 = vld [vmem:[%s854_s0 + $0x4] sm:$0x3] }
  0x12   :  { %580 = vmatprep.subr.bf16.mxu1 %v620_v0  ;;  %v614_v12 = vpack.c.bf16 %v71_v11, %v70_v10  ;;  %v386_v19 = vld.sshfl [vmem:[%s855_s2] sm:$0x13 pattern:$0x75316420] }
  0x13   :  { %v81_v21 = vcombine.high %v386_v19, %v386_v19  ;;  %v88_v22 = vrot.slane %v386_v19, %v87_v20 }
  0x14   :  { %558 = vmatpush3.bf16.msra.mxu0 %v557_v30 }
  0x15   :  { %582 = vmatpush3.bf16.msra.mxu1 %v581_v31  ;;  %559 = vmatprep.subr.bf16.mxu0 %v620_v0  ;;  %v95_v24 = vrot.slane %v81_v21, %v87_v20  ;;  %v100_v26 = vrot.slane %v88_v22, %v99_v23  ;;  %v96_v45 = vcombine.high %v88_v22, %v88_v22 }
  0x16   :  { %583 = vmatprep.subr.bf16.mxu1 %v620_v0 }
  0x17   :  { %v104_v28 = vrot.slane %v95_v24, %v99_v23  ;;  %v108_v46 = vrot.slane %v96_v45, %v99_v23 }
  0x18   :  { %561 = vmatpush3.bf16.msra.mxu0 %v560_v36 }
  0x19   :  { %585 = vmatpush3.bf16.msra.mxu1 %v584_v37  ;;  %562 = vmatprep.subr.bf16.mxu0 %v620_v0 }
  0x1a   :  { %586 = vmatprep.subr.bf16.mxu1 %v620_v0 }
  0x1c   :  { %564 = vmatpush3.bf16.msra.mxu0 %v563_v42 }
  0x1d   :  { %588 = vmatpush3.bf16.msra.mxu1 %v587_v43  ;;  %565 = vmatprep.subr.bf16.mxu0 %v620_v0 }
  0x1e   :  { %589 = vmatprep.subr.bf16.mxu1 %v620_v0 }
  0x20   :  { %567 = vmatpush3.bf16.msra.mxu0 %v566_v48 }
  0x21   :  { %591 = vmatpush3.bf16.msra.mxu1 %v590_v49  ;;  %592 = vmatprep.subr.bf16.mxu0 %v620_v0 }
  0x23   :  { %472 = vmatmul.mubr.f32.vlgmr.msra.gmra.mrb[0].mxu0 %v21_v52 }
  0x24   :  { %507 = vmatmul.mubr.f32.vlgmr.msra.gmra.mrb[0].mxu1 %v22_v54  ;;  %594 = vmatpush3.bf16.msra.mxu0 %v593_v53 }
  0x25   :  { %595 = vmatprep.subr.bf16.mxu0 %v620_v0  ;;  %541 = vmatprep.mubr.msk.f32.mxu0 %vm621_vm0, %v622_v8  ;;  %v69_v8 = vld [vmem:[%s853_s1 + $0x168] sm:$0xff] }
  0x26   :  { %v611_v9 = vpack.c.bf16 %v69_v8, %v68_v7 }
  0x28   :  { %597 = vmatpush3.bf16.msra.mxu0 %v596_v57  ;;  %v378_v57 = vstv %s857_s4 }
  0x29   :  { %598 = vmatprep.subr.bf16.mxu0 %v620_v0 }
  0x2c   :  { %600 = vmatpush3.bf16.msra.mxu0 %v599_v60 }
  0x2d   :  { %601 = vmatprep.subr.bf16.mxu0 %v620_v0 }
  0x30   :  { %603 = vmatpush3.bf16.msra.mxu0 %v602_v63 }
  0x31   :  { %604 = vmatprep.subr.bf16.mxu0 %v620_v0 }
  0x34   :  { %606 = vmatpush3.bf16.msra.mxu0 %v605_v3 }
  0x35   :  { %607 = vmatprep.subr.bf16.mxu0 %v620_v0 }
  0x38   :  { %609 = vmatpush3.bf16.msra.mxu0 %v608_v6 }
  0x39   :  { %610 = vmatprep.subr.bf16.mxu0 %v620_v0 }
  0x3c   :  { %612 = vmatpush3.bf16.msra.mxu0 %v611_v9 }
  0x3d   :  { %613 = vmatprep.subr.bf16.mxu0 %v620_v0  ;;  %v387_v0 = vld.sshfl [vmem:[%s856_s3] sm:$0x13 pattern:$0x75316420] }
  0x3e   :  { %v334_v25 = vcombine.high %v387_v0, %v387_v0  ;;  %v341_v27 = vrot.slane %v387_v0, %v87_v20 }
  0x40   :  { %615 = vmatpush3.bf16.msra.mxu0 %v614_v12  ;;  %v348_v29 = vrot.slane %v334_v25, %v87_v20  ;;  %v353_v32 = vrot.slane %v341_v27, %v99_v23  ;;  %v349_v47 = vcombine.high %v341_v27, %v341_v27 }
  0x42   :  { %v357_v36 = vrot.slane %v348_v29, %v99_v23  ;;  %v361_v50 = vrot.slane %v349_v47, %v99_v23 }
  0x43   :  { %542 = vmatmul.mubr.f32.vlgmr.msra.gmra.mrb[2].mxu0 %v23_v13 }
  0xf6   :  { %v178_v30 = vpop.f32.mrb[0].mxu0 }
  0xf7   :  { %v179_v31 = vadd.f32 %v178_v30, %v100_v26  ;;  %v473_v33 = vpop.f32.mrb[1].mxu0  ;;  %v248_v34 = vpop.f32.mrb[0].mxu1 }
  0xf8   :  { %v249_v35 = vadd.f32 %v248_v34, %v104_v28  ;;  %v508_v37 = vpop.f32.mrb[1].mxu1 }
  0xf9   :  { %v322_v38 = vmax.f32 %v179_v31, 0.0 }
  0xfa   :  { %v323_v39 = vmax.f32 %v249_v35, 0.0 }
  0xfb   :  { %v365_v40 = vmul.f32 %v353_v32, %v322_v38 }
  0xfc   :  { %v366_v41 = vmul.f32 %v357_v36, %v323_v39 }
  0xfd   :  { %v369_v42 = vsel %vm368_vm1, %v365_v40, 0.0 }
  0xfe   :  { %v370_v43 = vsel %vm368_vm1, %v366_v41, 0.0 }
  0xff   :  { %v371_v44 = vadd.f32 %v370_v43, %v369_v42 }
 0x116   :  { %v318_v48 = vpop.f32.mrb[2].mxu0 }
 0x117   :  { %v319_v49 = vadd.f32 %v318_v48, %v108_v46  ;;  %v543_v51 = vpop.f32.mrb[3].mxu0 }
 0x119   :  { %v324_v52 = vmax.f32 %v319_v49, 0.0 }
 0x11b   :  { %v367_v53 = vmul.f32 %v361_v50, %v324_v52 }
 0x11d   :  { %v372_v54 = vsel %vm368_vm1, %v367_v53, 0.0 }
 0x11e   :  { %v373_v55 = vadd.f32 %v372_v54, %v371_v44 }
 0x120   :  { %v374_v56 = vsel %vm368_vm1, %v373_v55, 0.0 }
 0x121   :  { %375 = vadd.xlane.f32.xlu0 %v374_v56 }
 0x1ae   :  { %v376_v58 = vpop.xlane.xlu0 %375 }
 0x1af   :  { %v379_v59 = vadd.f32 %v378_v57, %v376_v58 }
 0x1b1   :  { %381 = vst.msk [vmem:[%s858_s5] sm:$0x3] %vm380_vm2, %v379_v59 }

</bundles_post_ra>
